<compile_context>
chip_gen: v7x
topology: tpu7x:2x2x1
jax: 0.10.0
libtpu: 0.0.40
codegen_flags: <defaults>
</compile_context>

<pallas_src>
import jax
import jax.numpy as jnp
from jax.experimental import pallas as pl
from jax.experimental.pallas import tpu as pltpu

LANE = 128
FEATURES = 13


def affine_kernel(x_ref, w_ref, b_ref, o_ref):
    # x_ref: (TR, 128*13), w_ref: (128*13, 128), b_ref: (1, 1), o_ref: (TR, 128)
    # TODO(synk): training-mode dropout (pltpu.prng_* mask between layer 1 and 2)
    # is not emitted; eval semantics are used, which is what permits the
    # single-affine collapse done in the wrapper.
    o_ref[...] = (
        jnp.dot(x_ref[...], w_ref[...], preferred_element_type=jnp.float32)
        + b_ref[...]
    ).astype(o_ref.dtype)


def _round_up(n, m):
    return ((n + m - 1) // m) * m


def mlp_forward(x, params, *, block_rows=65536):
    """Inference forward of the 13->10->15->1 MLP. x: (B, 13) f32 -> (B, 1) f32."""
    w1, b1, w2, b2, w3, b3 = params
    B, F = x.shape
    assert F == FEATURES
    # block_rows multiple of 1024 => row-block (block_rows // 128) is a multiple
    # of 8 sublanes, satisfying the (8, 128) block rule for multi-tile grids.
    assert block_rows % 1024 == 0

    # ---- collapse the activation-free MLP into one affine map (exact in eval
    # mode; revert to the 3-matmul form if training-mode dropout is added). ----
    w_eff = (w1 @ w2 @ w3).astype(jnp.float32)              # (13, 1)
    b_eff = ((b1 @ w2 + b2) @ w3 + b3).astype(jnp.float32)  # (1, 1)

    # ---- tiling over batch: large tiles amortize the ~0.35us grid-step
    # overhead; small batches shrink to a single full-array tile. ----
    tm = min(block_rows, _round_up(B, LANE))   # rows per tile (multiple of 128)
    b_pad = _round_up(B, tm)
    if b_pad != B:
        x = jnp.pad(x, ((0, b_pad - B), (0, 0)))  # tail tile: no OOB reads

    # Free, contiguous reshape: pack 128 batch rows per VMEM row (lane-dense,
    # 128*13 = 1664 lanes, already a multiple of 128 -> zero lane padding).
    xr = x.reshape(b_pad // LANE, LANE * FEATURES)
    # Block-diagonal weight so the output lands lane-dense (batch on lanes).
    w_blk = jnp.kron(jnp.eye(LANE, dtype=jnp.float32), w_eff)  # (1664, 128)

    tr = tm // LANE
    out = pl.pallas_call(
        affine_kernel,
        out_shape=jax.ShapeDtypeStruct((b_pad // LANE, LANE), jnp.float32),
        grid=(b_pad // tm,),
        in_specs=[
            pl.BlockSpec((tr, LANE * FEATURES), lambda i: (i, 0)),
            pl.BlockSpec((LANE * FEATURES, LANE), lambda i: (0, 0)),  # resident
            pl.BlockSpec((1, 1), lambda i: (0, 0)),                   # resident
        ],
        out_specs=pl.BlockSpec((tr, LANE), lambda i: (i, 0)),
        compiler_params=pltpu.CompilerParams(
            # batch tiles are independent -> shard over v7x's 2 TensorCores;
            # harmless no-op on single-core v5e/v6e.
            dimension_semantics=("parallel",),
        ),
    )(xr, w_blk, b_eff)

    # Free reshape back to (b_pad, 1), drop the padded tail.
    return out.reshape(b_pad, 1)[:B]


def init_params(key):
    """Deterministic init mimicking PyTorch Linear default U(-1/sqrt(fan_in), ...).
    Weights stored already transposed to (in, out); biases as (1, out)."""
    dims = [(13, 10), (10, 15), (15, 1)]
    params = []
    for i, (fan_in, fan_out) in enumerate(dims):
        kw, kb = jax.random.split(jax.random.fold_in(key, i))
        bound = 1.0 / (fan_in ** 0.5)
        w = jax.random.uniform(kw, (fan_in, fan_out), jnp.float32, -bound, bound)
        b = jax.random.uniform(kb, (1, fan_out), jnp.float32, -bound, bound)
        params += [w, b]
    return tuple(params)


def reference_forward(x, params):
    w1, b1, w2, b2, w3, b3 = params
    h1 = x @ w1 + b1          # dense1
    h2 = h1 @ w2 + b2         # dense2 (dropout is identity in eval)
    return h2 @ w3 + b3       # dense3


if __name__ == "__main__":
    key = jax.random.PRNGKey(0)
    params = init_params(key)

    # Small-batch path: single full-array tile.
    x_small = jax.random.normal(jax.random.fold_in(key, 100), (8, 13), jnp.float32)
    out_small = jax.block_until_ready(mlp_forward(x_small, params))
    ref_small = reference_forward(x_small, params)
    assert out_small.shape == (8, 1), out_small.shape
    assert jnp.allclose(out_small, ref_small, atol=1e-4, rtol=1e-4), "small-batch mismatch"

    # Multi-tile path: exercises the batch grid, padding, and tail slicing.
    x_big = jax.random.normal(jax.random.fold_in(key, 200), (2500, 13), jnp.float32)
    out_big = jax.block_until_ready(mlp_forward(x_big, params, block_rows=1024))
    ref_big = reference_forward(x_big, params)
    assert out_big.shape == (2500, 1), out_big.shape
    assert jnp.allclose(out_big, ref_big, atol=1e-4, rtol=1e-4), "multi-tile mismatch"

    print("KERNEL_OK")
</pallas_src>

<mosaic_0001>
module attributes {stable_mosaic.version = 11 : i64} {
  func.func @affine_kernel(%arg0: i32, %arg1: memref<1x1664xf32, #tpu.memory_space<vmem>>, %arg2: memref<1664x128xf32, #tpu.memory_space<vmem>>, %arg3: memref<1x1xf32, #tpu.memory_space<vmem>>, %arg4: memref<1x128xf32, #tpu.memory_space<vmem>>) attributes {dimension_semantics = [#tpu.dimension_semantics<parallel>], iteration_bounds = array<i64: 1>, scalar_prefetch = 0 : i64, scratch_operands = 0 : i64, tpu.core_type = #tpu.core_type<tc>, window_params = [{transform_indices = @transform_0, window_bounds = array<i64: 1, 1664>}, {pipeline_mode = #tpu.pipeline_mode<synchronous>, transform_indices = @transform_1, window_bounds = array<i64: 1664, 128>}, {pipeline_mode = #tpu.pipeline_mode<synchronous>, transform_indices = @transform_2, window_bounds = array<i64: 1, 1>}, {transform_indices = @transform_3, window_bounds = array<i64: 1, 128>}]} {
    %c0 = arith.constant 0 : index
    %c0_0 = arith.constant 0 : index
    %0 = vector.load %arg1[%c0, %c0_0] : memref<1x1664xf32, #tpu.memory_space<vmem>>, vector<1x1664xf32>
    %c0_1 = arith.constant 0 : index
    %c0_2 = arith.constant 0 : index
    %1 = vector.load %arg2[%c0_1, %c0_2] : memref<1664x128xf32, #tpu.memory_space<vmem>>, vector<1664x128xf32>
    %cst = arith.constant dense<0.000000e+00> : vector<1x128xf32>
    %2 = tpu.matmul %0, %1, %cst {dimension_numbers = #tpu.dot_dimension_numbers<[1], [0], [0], [1], [0, 0, 1, 1], [], []>} : vector<1x1664xf32>, vector<1664x128xf32>, vector<1x128xf32> -> vector<1x128xf32>
    %c0_3 = arith.constant 0 : index
    %c0_4 = arith.constant 0 : index
    %3 = vector.load %arg3[%c0_3, %c0_4] : memref<1x1xf32, #tpu.memory_space<vmem>>, vector<1x1xf32>
    %4 = vector.broadcast %3 : vector<1x1xf32> to vector<1x128xf32>
    %5 = arith.addf %2, %4 : vector<1x128xf32>
    %c0_5 = arith.constant 0 : index
    %c0_6 = arith.constant 0 : index
    %6 = vector.load %arg4[%c0_5, %c0_6] : memref<1x128xf32, #tpu.memory_space<vmem>>, vector<1x128xf32>
    tpu.vector_store %arg4[%c0_5, %c0_6], %5 {strides = array<i32>} : memref<1x128xf32, #tpu.memory_space<vmem>>, vector<1x128xf32>,
    return
  }
  func.func @transform_0(%arg0: i32) -> (i32, i32) {
    %c0_i32 = arith.constant 0 : i32
    %c0_i32_0 = arith.constant 0 : i32
    return %arg0, %c0_i32 : i32, i32
  }
  func.func @transform_1(%arg0: i32) -> (i32, i32) {
    %c0_i32 = arith.constant 0 : i32
    %c0_i32_0 = arith.constant 0 : i32
    %c0_i32_1 = arith.constant 0 : i32
    return %c0_i32, %c0_i32_0 : i32, i32
  }
  func.func @transform_2(%arg0: i32) -> (i32, i32) {
    %c0_i32 = arith.constant 0 : i32
    %c0_i32_0 = arith.constant 0 : i32
    %c0_i32_1 = arith.constant 0 : i32
    return %c0_i32, %c0_i32_0 : i32, i32
  }
  func.func @transform_3(%arg0: i32) -> (i32, i32) {
    %c0_i32 = arith.constant 0 : i32
    %c0_i32_0 = arith.constant 0 : i32
    return %arg0, %c0_i32 : i32, i32
  }
}

</mosaic_0001>

<bundles_post_ra>
// kernel: tpu_custom_call.1
= control target key start
LH: loop header
LB: loop body
LE: loop exit
PB: predicated region body
PF: predicated region fallthrough
CT: control target
= control target key end

     0   :  { %s1520_s0 = inlined_call_operand.hbm [shape: f32[1,1664], index: 0, kind: input, shape index: {}]   ;;  %s1521_s1 = inlined_call_operand.hbm [shape: f32[1664,128], index: 1, kind: input, shape index: {}]   ;;  %s1522_s2 = inlined_call_operand.<no memory space> [shape: f32[1,1], index: 2, kind: input, shape index: {}]   ;;  %s1523_s3 = inlined_call_operand.hbm [shape: f32[1,128], index: 3, kind: output, shape index: {}]  }
   0x1   :  { %v8_v0 = vstv %s1522_s2 }
   0x2   :  { %9 = vst [vmem:[#allocation2] sm:$0x1] %v8_v0 }
   0x3   :  { %10 = vsyncpa [#allocation4], 0 }
   0x4   :  { %11 = vsyncpa [#allocation7], 0 }
   0x5   :  { %12 = vsyncpa [#allocation5], 0  ;;  %s1397_s14 = smov [#allocation3]   ;;  %s1398_s16 = smov [#allocation6]  }
   0x6   :  { %s19_s15 = sshll.u32 %s1397_s14, 4  ;;  %s28_s17 = sshll.u32 %s1398_s16, 4  ;;  %s20_s15 = int_to_ptr.vmem [resolvable:$true] %s19_s15  ;;  %s1429_s17 = int_to_ptr.vmem [resolvable:$true] %s28_s17 }
   0x7   :  { %s1325_s20 = scalar_lea.hbm %s1520_s0, 208 }
   0x8   :  { %p1326_p0 = scmp.ne.s32.totalorder %s1520_s0, %s1325_s20  ;;  %p1329_p1 = scmp.lt.u32.totalorder %s1325_s20, %s1520_s0 }
   0xa   :  { %p1331_p2 = pnand %p1329_p1, %p1326_p0 }
   0xc   :  { %1334 = shalt.err (!%p1331_p2)
}
   0xd   :  { %s1335_s24 = scalar_lea.vmem %s20_s15, 208  ;;  %s1339_s25 = scalar_lea.vmem %s20_s15, 224 }
   0xe   :  { %p1336_p3 = scmp.ne.s32.totalorder %s20_s15, %s1335_s24  ;;  %p1340_p4 = scmp.lt.s32.totalorder %s20_s15, %s20_s15 }
   0xf   :  { %p1341_p5 = scmp.lt.s32.totalorder %s1339_s25, %s1335_s24 }
  0x11   :  { %p1342_p6 = por %p1341_p5, %p1340_p4 }
  0x13   :  { %p1343_p7 = pnand %p1342_p6, %p1336_p3 }
  0x15   :  { %1346 = shalt.err (!%p1343_p7)
}
  0x16   :  { %22 = dma.hbm_to_vmem [thread:$0]  %s1520_s0, 208, %s20_s15, [#allocation4]  }
  0x17   :  { %s1347_s30 = scalar_lea.hbm %s1521_s1, 26624 }
  0x18   :  { %p1348_p8 = scmp.ne.s32.totalorder %s1521_s1, %s1347_s30  ;;  %p1351_p9 = scmp.lt.u32.totalorder %s1347_s30, %s1521_s1 }
  0x1a   :  { %p1353_p10 = pnand %p1351_p9, %p1348_p8 }
  0x1c   :  { %1356 = shalt.err (!%p1353_p10)
}
  0x1d   :  { %s1357_s8 = scalar_lea.vmem %s1429_s17, 26624  ;;  %p1362_p12 = scmp.lt.s32.totalorder %s1429_s17, %s1429_s17 }
  0x1e   :  { %p1358_p11 = scmp.ne.s32.totalorder %s1429_s17, %s1357_s8  ;;  %p1363_p13 = scmp.lt.s32.totalorder %s1357_s8, %s1357_s8 }
  0x20   :  { %p1364_p0 = por %p1363_p13, %p1362_p12 }
  0x22   :  { %p1365_p1 = pnand %p1364_p0, %p1358_p11 }
  0x24   :  { %1368 = shalt.err (!%p1365_p1)
}
  0x25   :  { %s1399_s0 = smov 128   ;;  %s1400_s9 = smov 8  }
  0x26   :  { %34 = dma.hbm_to_vmem [thread:$0]  %s1521_s1, 26624, %s1429_s17, [#allocation7], %s1399_s0, %s1399_s0, %s1400_s9  }
  0x27   :  { %1391 = dma.done.wait [#allocation4], 208  }
  0x28   :  { %1392 = vsyncadd [#allocation4], 4294967088 }
  0x29   :  { %1393 = dma.done.wait [#allocation7], 26624  }
  0x2a   :  { %1394 = vsyncadd [#allocation7], 4294940672  ;;  %v1401_v1 = vmov 0   ;;  %v61_v2 = vld [vmem:[#allocation6 + $0x80] sm:$0xff]  ;;  %v62_v3 = vld [vmem:[#allocation6 + $0x88] sm:$0xff]  ;;  %v259_v45 = vlaneseq  ;;  %vm1403_vm0 = vmmov 0  }
  0x2b   :  { %1324 = vset.pattern.permute.xlu0 %v1401_v1  ;;  %v45_v4 = vld [vmem:[#allocation6] sm:$0xff]  ;;  %v1099_v5 = vpack.c.bf16 %v62_v3, %v61_v2  ;;  %v46_v6 = vld [vmem:[#allocation6 + $0x8] sm:$0xff]  ;;  %v63_v13 = vld [vmem:[#allocation6 + $0x90] sm:$0xff]  ;;  %s1405_s1 = smov [#allocation8]  }
  0x2c   :  { %v93_v7 = vld [vmem:[#allocation6 + $0x180] sm:$0xff]  ;;  %v94_v8 = vld [vmem:[#allocation6 + $0x188] sm:$0xff]  ;;  %v1101_v9 = vpack.c.bf16 %v46_v6, %v45_v4  ;;  %v64_v15 = vld [vmem:[#allocation6 + $0x98] sm:$0xff]  ;;  %v1460_v59 = vshrl.u32 %v259_v45, 7  ;;  %s827_s12 = sshll.u32 %s1405_s1, 4  ;;  %s828_s12 = int_to_ptr.vmem [resolvable:$true] %s827_s12 }
  0x2d   :  { %v1131_v10 = vpack.c.bf16 %v94_v8, %v93_v7  ;;  %v77_v11 = vld [vmem:[#allocation6 + $0x100] sm:$0xff]  ;;  %v78_v12 = vld [vmem:[#allocation6 + $0x108] sm:$0xff]  ;;  %1100 = vmatprep.subr.bf16.mxu0 %v1099_v5  ;;  %v47_v16 = vld [vmem:[#allocation6 + $0x10] sm:$0xff]  ;;  %v1103_v18 = vpack.c.bf16 %v64_v15, %v63_v13  ;;  %s1369_s13 = scalar_lea.vmem %s828_s12, 16  ;;  %s1373_s14 = scalar_lea.vmem %s828_s12, 32 }
  0x2e   :  { %v1133_v14 = vpack.c.bf16 %v78_v12, %v77_v11  ;;  %v48_v17 = vld [vmem:[#allocation6 + $0x18] sm:$0xff]  ;;  %1102 = vmatpush3.bf16.msra.mxu0 %v1101_v9  ;;  %v95_v20 = vld [vmem:[#allocation6 + $0x190] sm:$0xff]  ;;  %v65_v25 = vld [vmem:[#allocation6 + $0xa0] sm:$0xff]  ;;  %v271_v8 = vsub.s32 1, %v1460_v59  ;;  %v279_v13 = vsub.s32 3, %v1460_v59  ;;  %v275_v45 = vsub.s32 2, %v1460_v59  ;;  %p1370_p2 = scmp.ne.s32.totalorder %s828_s12, %s1369_s13  ;;  %p1374_p3 = scmp.lt.s32.totalorder %s828_s12, %s828_s12 }
  0x2f   :  { %1132 = vmatprep.subr.bf16.mxu1 %v1131_v10  ;;  %v1105_v19 = vpack.c.bf16 %v48_v17, %v47_v16  ;;  %v96_v21 = vld [vmem:[#allocation6 + $0x198] sm:$0xff]  ;;  %v79_v22 = vld [vmem:[#allocation6 + $0x110] sm:$0xff]  ;;  %v66_v26 = vld [vmem:[#allocation6 + $0xa8] sm:$0xff]  ;;  %1104 = vmatprep.subr.bf16.mxu0 %v1103_v18  ;;  %p1375_p4 = scmp.lt.s32.totalorder %s1373_s14, %s1369_s13 }
  0x30   :  { %1134 = vmatpush3.bf16.msra.mxu1 %v1133_v14  ;;  %v1135_v23 = vpack.c.bf16 %v96_v21, %v95_v20  ;;  %v80_v24 = vld [vmem:[#allocation6 + $0x118] sm:$0xff]  ;;  %v1107_v28 = vpack.c.bf16 %v66_v26, %v65_v25  ;;  %v49_v29 = vld [vmem:[#allocation6 + $0x20] sm:$0xff]  ;;  %v50_v30 = vld [vmem:[#allocation6 + $0x28] sm:$0xff] }
  0x31   :  { %v1137_v27 = vpack.c.bf16 %v80_v24, %v79_v22  ;;  %v97_v31 = vld [vmem:[#allocation6 + $0x1a0] sm:$0xff]  ;;  %v98_v32 = vld [vmem:[#allocation6 + $0x1a8] sm:$0xff]  ;;  %v1109_v35 = vpack.c.bf16 %v50_v30, %v49_v29  ;;  %v67_v37 = vld [vmem:[#allocation6 + $0xb0] sm:$0xff]  ;;  %p1376_p5 = por %p1375_p4, %p1374_p3 }
  0x32   :  { %1136 = vmatprep.subr.bf16.mxu1 %v1135_v23  ;;  %v81_v33 = vld [vmem:[#allocation6 + $0x120] sm:$0xff]  ;;  %v82_v34 = vld [vmem:[#allocation6 + $0x128] sm:$0xff]  ;;  %1106 = vmatpush3.bf16.msra.mxu0 %v1105_v19  ;;  %v1139_v36 = vpack.c.bf16 %v98_v32, %v97_v31  ;;  %v68_v38 = vld [vmem:[#allocation6 + $0xb8] sm:$0xff] }
  0x33   :  { %v51_v39 = vld [vmem:[#allocation6 + $0x30] sm:$0xff]  ;;  %1108 = vmatprep.subr.bf16.mxu0 %v1107_v28  ;;  %v1141_v40 = vpack.c.bf16 %v82_v34, %v81_v33  ;;  %v1111_v41 = vpack.c.bf16 %v68_v38, %v67_v37  ;;  %v52_v42 = vld [vmem:[#allocation6 + $0x38] sm:$0xff]  ;;  %v69_v49 = vld [vmem:[#allocation6 + $0xc0] sm:$0xff]  ;;  %p1377_p6 = pnand %p1376_p5, %p1370_p2 }
  0x34   :  { %1138 = vmatpush3.bf16.msra.mxu1 %v1137_v27  ;;  %v99_v43 = vld [vmem:[#allocation6 + $0x1b0] sm:$0xff]  ;;  %v100_v44 = vld [vmem:[#allocation6 + $0x1b8] sm:$0xff]  ;;  %v70_v50 = vld [vmem:[#allocation6 + $0xc8] sm:$0xff]  ;;  %v1113_v51 = vpack.c.bf16 %v52_v42, %v51_v39 }
  0x35   :  { %1140 = vmatprep.subr.bf16.mxu1 %v1139_v36  ;;  %v1143_v46 = vpack.c.bf16 %v100_v44, %v99_v43  ;;  %v83_v47 = vld [vmem:[#allocation6 + $0x130] sm:$0xff]  ;;  %v84_v48 = vld [vmem:[#allocation6 + $0x138] sm:$0xff]  ;;  %v101_v52 = vld [vmem:[#allocation6 + $0x1c0] sm:$0xff]  ;;  %v1115_v55 = vpack.c.bf16 %v70_v50, %v69_v49 }
  0x36   :  { %1110 = vmatpush3.bf16.msra.mxu0 %v1109_v35  ;;  %v102_v53 = vld [vmem:[#allocation6 + $0x1c8] sm:$0xff]  ;;  %v1145_v54 = vpack.c.bf16 %v84_v48, %v83_v47  ;;  %v53_v56 = vld [vmem:[#allocation6 + $0x40] sm:$0xff]  ;;  %v71_v62 = vld [vmem:[#allocation6 + $0xd0] sm:$0xff] }
  0x37   :  { %1112 = vmatprep.subr.bf16.mxu0 %v1111_v41  ;;  %v54_v57 = vld [vmem:[#allocation6 + $0x48] sm:$0xff]  ;;  %v85_v58 = vld [vmem:[#allocation6 + $0x140] sm:$0xff]  ;;  %v1147_v60 = vpack.c.bf16 %v102_v53, %v101_v52  ;;  %v72_v63 = vld [vmem:[#allocation6 + $0xd8] sm:$0xff]  ;;  %v1473_v41 = vsub.s32 0, %v1460_v59 }
  0x38   :  { %1142 = vmatpush3.bf16.msra.mxu1 %v1141_v40  ;;  %v86_v61 = vld [vmem:[#allocation6 + $0x148] sm:$0xff]  ;;  %v103_v0 = vld [vmem:[#allocation6 + $0x1d0] sm:$0xff]  ;;  %v104_v1 = vld [vmem:[#allocation6 + $0x1d8] sm:$0xff]  ;;  %v1117_v2 = vpack.c.bf16 %v54_v57, %v53_v56  ;;  %v1119_v4 = vpack.c.bf16 %v72_v63, %v71_v62 }
  0x39   :  { %1144 = vmatprep.subr.bf16.mxu1 %v1143_v46  ;;  %v1149_v3 = vpack.c.bf16 %v86_v61, %v85_v58  ;;  %v55_v5 = vld [vmem:[#allocation6 + $0x50] sm:$0xff]  ;;  %v56_v6 = vld [vmem:[#allocation6 + $0x58] sm:$0xff]  ;;  %v1151_v9 = vpack.c.bf16 %v104_v1, %v103_v0  ;;  %v73_v11 = vld [vmem:[#allocation6 + $0xe0] sm:$0xff] }
  0x3a   :  { %1114 = vmatpush3.bf16.msra.mxu0 %v1113_v51  ;;  %v87_v7 = vld [vmem:[#allocation6 + $0x150] sm:$0xff]  ;;  %v88_v10 = vld [vmem:[#allocation6 + $0x158] sm:$0xff]  ;;  %v74_v12 = vld [vmem:[#allocation6 + $0xe8] sm:$0xff]  ;;  %v1121_v16 = vpack.c.bf16 %v56_v6, %v55_v5 }
  0x3b   :  { %1116 = vmatprep.subr.bf16.mxu0 %v1115_v55  ;;  %v105_v14 = vld [vmem:[#allocation6 + $0x1e0] sm:$0xff]  ;;  %v106_v15 = vld [vmem:[#allocation6 + $0x1e8] sm:$0xff]  ;;  %v1464_v17 = vld [vmem:[#allocation3] sm:$0xff]  ;;  %v1153_v18 = vpack.c.bf16 %v88_v10, %v87_v7  ;;  %v1123_v19 = vpack.c.bf16 %v74_v12, %v73_v11  ;;  %v287_v55 = vsub.s32 5, %v1460_v59 }
  0x3c   :  { %1146 = vmatpush3.bf16.msra.mxu1 %v1145_v54  ;;  %v57_v20 = vld [vmem:[#allocation6 + $0x60] sm:$0xff]  ;;  %v58_v21 = vld [vmem:[#allocation6 + $0x68] sm:$0xff]  ;;  %v272_v23 = vrot.slane %v1464_v17, %v271_v8  ;;  %v1155_v24 = vpack.c.bf16 %v106_v15, %v105_v14  ;;  %v75_v26 = vld [vmem:[#allocation6 + $0xf0] sm:$0xff]  ;;  %v280_v28 = vrot.slane %v1464_v17, %v279_v13  ;;  %v268_v56 = vrot.slane %v1464_v17, %v1473_v41 }
  0x3d   :  { %1148 = vmatprep.subr.bf16.mxu1 %v1147_v60  ;;  %v89_v22 = vld [vmem:[#allocation6 + $0x160] sm:$0xff]  ;;  %v90_v25 = vld [vmem:[#allocation6 + $0x168] sm:$0xff]  ;;  %v76_v27 = vld [vmem:[#allocation6 + $0xf8] sm:$0xff]  ;;  %v1125_v31 = vpack.c.bf16 %v58_v21, %v57_v20  ;;  %v295_v60 = vsub.s32 7, %v1460_v59  ;;  %v276_v62 = vrot.slane %v1464_v17, %v275_v45 }
  0x3e   :  { %1118 = vmatpush3.bf16.msra.mxu0 %v1117_v2  ;;  %v107_v29 = vld [vmem:[#allocation6 + $0x1f0] sm:$0xff]  ;;  %v108_v30 = vld [vmem:[#allocation6 + $0x1f8] sm:$0xff]  ;;  %394 = vmatprep.mubr.f32.mxu0 %v272_v23  ;;  %v1157_v32 = vpack.c.bf16 %v90_v25, %v89_v22  ;;  %v1127_v33 = vpack.c.bf16 %v76_v27, %v75_v26  ;;  %v125_v39 = vld [vmem:[#allocation6 + $0x280] sm:$0xff] }
  0x3f   :  { %1120 = vmatprep.subr.bf16.mxu0 %v1119_v4  ;;  %464 = vmatprep.mubr.f32.mxu1 %v280_v28  ;;  %v59_v34 = vld [vmem:[#allocation6 + $0x70] sm:$0xff]  ;;  %v60_v35 = vld [vmem:[#allocation6 + $0x78] sm:$0xff]  ;;  %v1159_v37 = vpack.c.bf16 %v108_v30, %v107_v29  ;;  %v126_v40 = vld [vmem:[#allocation6 + $0x288] sm:$0xff]  ;;  %v296_v12 = vrot.slane %v1464_v17, %v295_v60 }
  0x40   :  { %1150 = vmatpush3.bf16.msra.mxu1 %v1149_v3  ;;  %v91_v36 = vld [vmem:[#allocation6 + $0x170] sm:$0xff]  ;;  %v92_v38 = vld [vmem:[#allocation6 + $0x178] sm:$0xff]  ;;  %v157_v42 = vld [vmem:[#allocation6 + $0x380] sm:$0xff]  ;;  %v1129_v44 = vpack.c.bf16 %v60_v35, %v59_v34  ;;  %v1163_v47 = vpack.c.bf16 %v126_v40, %v125_v39 }
  0x41   :  { %1152 = vmatprep.subr.bf16.mxu1 %v1151_v9  ;;  %v158_v43 = vld [vmem:[#allocation6 + $0x388] sm:$0xff]  ;;  %v1161_v46 = vpack.c.bf16 %v92_v38, %v91_v36  ;;  %v109_v48 = vld [vmem:[#allocation6 + $0x200] sm:$0xff]  ;;  %v127_v53 = vld [vmem:[#allocation6 + $0x290] sm:$0xff]  ;;  %v288_v9 = vrot.slane %v1464_v17, %v287_v55 }
  0x42   :  { %1122 = vmatpush3.bf16.msra.mxu0 %v1121_v16  ;;  %v110_v49 = vld [vmem:[#allocation6 + $0x208] sm:$0xff]  ;;  %v141_v50 = vld [vmem:[#allocation6 + $0x300] sm:$0xff]  ;;  %v1195_v51 = vpack.c.bf16 %v158_v43, %v157_v42  ;;  %v128_v54 = vld [vmem:[#allocation6 + $0x298] sm:$0xff] }
  0x43   :  { %1124 = vmatprep.subr.bf16.mxu0 %v1123_v19  ;;  %v142_v52 = vld [vmem:[#allocation6 + $0x308] sm:$0xff]  ;;  %v159_v57 = vld [vmem:[#allocation6 + $0x390] sm:$0xff]  ;;  %v160_v58 = vld [vmem:[#allocation6 + $0x398] sm:$0xff]  ;;  %v1165_v61 = vpack.c.bf16 %v110_v49, %v109_v48  ;;  %v1167_v0 = vpack.c.bf16 %v128_v54, %v127_v53 }
  0x44   :  { %1154 = vmatpush3.bf16.msra.mxu1 %v1153_v18  ;;  %v1197_v63 = vpack.c.bf16 %v142_v52, %v141_v50  ;;  %v111_v1 = vld [vmem:[#allocation6 + $0x210] sm:$0xff]  ;;  %v112_v2 = vld [vmem:[#allocation6 + $0x218] sm:$0xff]  ;;  %v1199_v4 = vpack.c.bf16 %v160_v58, %v159_v57  ;;  %v129_v6 = vld [vmem:[#allocation6 + $0x2a0] sm:$0xff] }
  0x45   :  { %1156 = vmatprep.subr.bf16.mxu1 %v1155_v24  ;;  %v143_v3 = vld [vmem:[#allocation6 + $0x310] sm:$0xff]  ;;  %v144_v5 = vld [vmem:[#allocation6 + $0x318] sm:$0xff]  ;;  %v130_v7 = vld [vmem:[#allocation6 + $0x2a8] sm:$0xff]  ;;  %v1169_v14 = vpack.c.bf16 %v112_v2, %v111_v1 }
  0x46   :  { %1126 = vmatpush3.bf16.msra.mxu0 %v1125_v31  ;;  %v161_v10 = vld [vmem:[#allocation6 + $0x3a0] sm:$0xff]  ;;  %v162_v11 = vld [vmem:[#allocation6 + $0x3a8] sm:$0xff]  ;;  %v1201_v15 = vpack.c.bf16 %v144_v5, %v143_v3  ;;  %v1171_v16 = vpack.c.bf16 %v130_v7, %v129_v6  ;;  %v131_v23 = vld [vmem:[#allocation6 + $0x2b0] sm:$0xff] }
  0x47   :  { %1128 = vmatprep.subr.bf16.mxu0 %v1127_v33  ;;  %v113_v18 = vld [vmem:[#allocation6 + $0x220] sm:$0xff]  ;;  %v114_v19 = vld [vmem:[#allocation6 + $0x228] sm:$0xff]  ;;  %v1203_v21 = vpack.c.bf16 %v162_v11, %v161_v10  ;;  %v132_v24 = vld [vmem:[#allocation6 + $0x2b8] sm:$0xff] }
  0x48   :  { %1158 = vmatpush3.bf16.msra.mxu1 %v1157_v32  ;;  %v145_v20 = vld [vmem:[#allocation6 + $0x320] sm:$0xff]  ;;  %v146_v22 = vld [vmem:[#allocation6 + $0x328] sm:$0xff]  ;;  %v163_v25 = vld [vmem:[#allocation6 + $0x3b0] sm:$0xff]  ;;  %v1173_v27 = vpack.c.bf16 %v114_v19, %v113_v18  ;;  %v1175_v29 = vpack.c.bf16 %v132_v24, %v131_v23 }
  0x49   :  { %1160 = vmatprep.subr.bf16.mxu1 %v1159_v37  ;;  %v164_v26 = vld [vmem:[#allocation6 + $0x3b8] sm:$0xff]  ;;  %v1205_v28 = vpack.c.bf16 %v146_v22, %v145_v20  ;;  %v115_v30 = vld [vmem:[#allocation6 + $0x230] sm:$0xff]  ;;  %v133_v35 = vld [vmem:[#allocation6 + $0x2c0] sm:$0xff] }
  0x4a   :  { %1130 = vmatpush3.bf16.msra.mxu0 %v1129_v44  ;;  %v116_v31 = vld [vmem:[#allocation6 + $0x238] sm:$0xff]  ;;  %v147_v32 = vld [vmem:[#allocation6 + $0x330] sm:$0xff]  ;;  %v1207_v33 = vpack.c.bf16 %v164_v26, %v163_v25  ;;  %v134_v36 = vld [vmem:[#allocation6 + $0x2c8] sm:$0xff] }
  0x4b   :  { %1164 = vmatprep.subr.bf16.mxu0 %v1163_v47  ;;  %v148_v34 = vld [vmem:[#allocation6 + $0x338] sm:$0xff]  ;;  %v165_v37 = vld [vmem:[#allocation6 + $0x3c0] sm:$0xff]  ;;  %v166_v38 = vld [vmem:[#allocation6 + $0x3c8] sm:$0xff]  ;;  %v1177_v39 = vpack.c.bf16 %v116_v31, %v115_v30  ;;  %v1179_v42 = vpack.c.bf16 %v134_v36, %v133_v35  ;;  %v291_v31 = vsub.s32 6, %v1460_v59 }
  0x4c   :  { %1162 = vmatpush3.bf16.msra.mxu1 %v1161_v46  ;;  %v1209_v40 = vpack.c.bf16 %v148_v34, %v147_v32  ;;  %v117_v43 = vld [vmem:[#allocation6 + $0x240] sm:$0xff]  ;;  %v118_v44 = vld [vmem:[#allocation6 + $0x248] sm:$0xff]  ;;  %v1211_v47 = vpack.c.bf16 %v166_v38, %v165_v37  ;;  %v135_v49 = vld [vmem:[#allocation6 + $0x2d0] sm:$0xff] }
  0x4d   :  { %1196 = vmatprep.subr.bf16.mxu1 %v1195_v51  ;;  %395 = vmatmul.mubr.f32.vlgmr.msra.gmra.mrb[0].mxu0 %v268_v56  ;;  %v149_v46 = vld [vmem:[#allocation6 + $0x340] sm:$0xff]  ;;  %v150_v48 = vld [vmem:[#allocation6 + $0x348] sm:$0xff]  ;;  %v136_v50 = vld [vmem:[#allocation6 + $0x2d8] sm:$0xff]  ;;  %v1181_v53 = vpack.c.bf16 %v118_v44, %v117_v43 }
  0x4e   :  { %1166 = vmatpush3.bf16.msra.mxu0 %v1165_v61  ;;  %534 = vmatprep.mubr.f32.mxu0 %v288_v9  ;;  %v167_v51 = vld [vmem:[#allocation6 + $0x3d0] sm:$0xff]  ;;  %v168_v52 = vld [vmem:[#allocation6 + $0x3d8] sm:$0xff]  ;;  %v1213_v54 = vpack.c.bf16 %v150_v48, %v149_v46  ;;  %v1183_v55 = vpack.c.bf16 %v136_v50, %v135_v49  ;;  %v170_v1 = vld [vmem:[#allocation6 + $0x3e8] sm:$0xff]  ;;  %v292_v48 = vrot.slane %v1464_v17, %v291_v31 }
  0x4f   :  { %465 = vmatmul.mubr.f32.vlgmr.msra.gmra.mrb[0].mxu1 %v276_v62  ;;  %1168 = vmatprep.subr.bf16.mxu0 %v1167_v0  ;;  %v119_v56 = vld [vmem:[#allocation6 + $0x250] sm:$0xff]  ;;  %v120_v57 = vld [vmem:[#allocation6 + $0x258] sm:$0xff]  ;;  %v1215_v60 = vpack.c.bf16 %v168_v52, %v167_v51  ;;  %v137_v62 = vld [vmem:[#allocation6 + $0x2e0] sm:$0xff] }
  0x50   :  { %1198 = vmatpush3.bf16.msra.mxu1 %v1197_v63  ;;  %604 = vmatprep.mubr.f32.mxu1 %v296_v12  ;;  %v151_v58 = vld [vmem:[#allocation6 + $0x350] sm:$0xff]  ;;  %v152_v61 = vld [vmem:[#allocation6 + $0x358] sm:$0xff]  ;;  %v138_v63 = vld [vmem:[#allocation6 + $0x2e8] sm:$0xff]  ;;  %v1185_v2 = vpack.c.bf16 %v120_v57, %v119_v56 }
  0x51   :  { %1200 = vmatprep.subr.bf16.mxu1 %v1199_v4  ;;  %v169_v0 = vld [vmem:[#allocation6 + $0x3e0] sm:$0xff]  ;;  %v1217_v3 = vpack.c.bf16 %v152_v61, %v151_v58  ;;  %v1187_v4 = vpack.c.bf16 %v138_v63, %v137_v62  ;;  %v122_v6 = vld [vmem:[#allocation6 + $0x268] sm:$0xff]  ;;  %v139_v11 = vld [vmem:[#allocation6 + $0x2f0] sm:$0xff] }
  0x52   :  { %1170 = vmatpush3.bf16.msra.mxu0 %v1169_v14  ;;  %v121_v5 = vld [vmem:[#allocation6 + $0x260] sm:$0xff]  ;;  %v1219_v9 = vpack.c.bf16 %v170_v1, %v169_v0  ;;  %v154_v10 = vld [vmem:[#allocation6 + $0x368] sm:$0xff]  ;;  %v140_v12 = vld [vmem:[#allocation6 + $0x2f8] sm:$0xff] }
  0x53   :  { %1172 = vmatprep.subr.bf16.mxu0 %v1171_v16  ;;  %v153_v7 = vld [vmem:[#allocation6 + $0x360] sm:$0xff]  ;;  %v171_v14 = vld [vmem:[#allocation6 + $0x3f0] sm:$0xff]  ;;  %v1189_v16 = vpack.c.bf16 %v122_v6, %v121_v5  ;;  %v1191_v19 = vpack.c.bf16 %v140_v12, %v139_v11  ;;  %v156_v24 = vld [vmem:[#allocation6 + $0x378] sm:$0xff] }
  0x54   :  { %1202 = vmatpush3.bf16.msra.mxu1 %v1201_v15  ;;  %v172_v15 = vld [vmem:[#allocation6 + $0x3f8] sm:$0xff]  ;;  %v1221_v18 = vpack.c.bf16 %v154_v10, %v153_v7  ;;  %v123_v20 = vld [vmem:[#allocation6 + $0x270] sm:$0xff]  ;;  %v189_v25 = vld [vmem:[#allocation6 + $0x480] sm:$0xff] }
  0x55   :  { %1204 = vmatprep.subr.bf16.mxu1 %v1203_v21  ;;  %v124_v21 = vld [vmem:[#allocation6 + $0x278] sm:$0xff]  ;;  %v155_v22 = vld [vmem:[#allocation6 + $0x370] sm:$0xff]  ;;  %v1223_v23 = vpack.c.bf16 %v172_v15, %v171_v14  ;;  %v190_v26 = vld [vmem:[#allocation6 + $0x488] sm:$0xff] }
  0x56   :  { %1174 = vmatpush3.bf16.msra.mxu0 %v1173_v27  ;;  %v283_v27 = vsub.s32 4, %v1460_v59  ;;  %v1193_v30 = vpack.c.bf16 %v124_v21, %v123_v20  ;;  %v1225_v32 = vpack.c.bf16 %v156_v24, %v155_v22  ;;  %v173_v34 = vld [vmem:[#allocation6 + $0x400] sm:$0xff]  ;;  %v174_v35 = vld [vmem:[#allocation6 + $0x408] sm:$0xff]  ;;  %v223_v43 = vld [vmem:[#allocation6 + $0x590] sm:$0xff] }
  0x57   :  { %1176 = vmatprep.subr.bf16.mxu0 %v1175_v29  ;;  %v222_v29 = vld [vmem:[#allocation6 + $0x588] sm:$0xff]  ;;  %v205_v36 = vld [vmem:[#allocation6 + $0x500] sm:$0xff]  ;;  %v224_v44 = vld [vmem:[#allocation6 + $0x598] sm:$0xff] }
  0x58   :  { %1206 = vmatpush3.bf16.msra.mxu1 %v1205_v28  ;;  %v221_v28 = vld [vmem:[#allocation6 + $0x580] sm:$0xff]  ;;  %v206_v38 = vld [vmem:[#allocation6 + $0x508] sm:$0xff]  ;;  %v1490_v46 = vld [vmem:[#allocation3 + $0x8] sm:$0x1f] }
  0x59   :  { %1208 = vmatprep.subr.bf16.mxu1 %v1207_v33  ;;  %v1227_v33 = vpack.c.bf16 %v190_v26, %v189_v25  ;;  %v1259_v37 = vpack.c.bf16 %v222_v29, %v221_v28  ;;  %v1261_v49 = vpack.c.bf16 %v206_v38, %v205_v36  ;;  %v175_v51 = vld [vmem:[#allocation6 + $0x410] sm:$0xff]  ;;  %v176_v52 = vld [vmem:[#allocation6 + $0x418] sm:$0xff]  ;;  %v193_v56 = vld [vmem:[#allocation6 + $0x4a0] sm:$0xff]  ;;  %v304_v58 = vrot.slane %v1490_v46, %v271_v8 }
  0x5a   :  { %1178 = vmatpush3.bf16.msra.mxu0 %v1177_v39  ;;  %v191_v39 = vld [vmem:[#allocation6 + $0x490] sm:$0xff]  ;;  %v194_v57 = vld [vmem:[#allocation6 + $0x4a8] sm:$0xff]  ;;  %v1233_v62 = vpack.c.bf16 %v176_v52, %v175_v51  ;;  %v196_v7 = vld [vmem:[#allocation6 + $0x4b8] sm:$0xff] }
  0x5b   :  { %1180 = vmatprep.subr.bf16.mxu0 %v1179_v42  ;;  %v284_v42 = vrot.slane %v1464_v17, %v283_v27  ;;  %v226_v61 = vld [vmem:[#allocation6 + $0x5a8] sm:$0xff]  ;;  %v312_v17 = vrot.slane %v1490_v46, %v279_v13  ;;  %v253_v63 = vld [vmem:[#allocation2] sm:$0x1]  ;;  %v1235_v1 = vpack.c.bf16 %v194_v57, %v193_v56  ;;  %v228_v10 = vld [vmem:[#allocation6 + $0x5b8] sm:$0xff] }
  0x5c   :  { %1210 = vmatpush3.bf16.msra.mxu1 %v1209_v40  ;;  %v192_v40 = vld [vmem:[#allocation6 + $0x498] sm:$0xff]  ;;  %v210_v5 = vld [vmem:[#allocation6 + $0x528] sm:$0xff]  ;;  %v195_v6 = vld [vmem:[#allocation6 + $0x4b0] sm:$0xff]  ;;  %256 = vperm.xlu0 %1324, %v253_v63  }
  0x5d   :  { %1212 = vmatprep.subr.bf16.mxu1 %v1211_v47  ;;  %v1229_v47 = vpack.c.bf16 %v174_v35, %v173_v34  ;;  %v1231_v50 = vpack.c.bf16 %v192_v40, %v191_v39  ;;  %v1239_v12 = vpack.c.bf16 %v196_v7, %v195_v6  ;;  %v179_v14 = vld [vmem:[#allocation6 + $0x430] sm:$0xff]  ;;  %v180_v15 = vld [vmem:[#allocation6 + $0x438] sm:$0xff]  ;;  %v197_v20 = vld [vmem:[#allocation6 + $0x4c0] sm:$0xff] }
  0x5e   :  { %1182 = vmatpush3.bf16.msra.mxu0 %v1181_v53  ;;  %v207_v53 = vld [vmem:[#allocation6 + $0x510] sm:$0xff]  ;;  %v198_v21 = vld [vmem:[#allocation6 + $0x4c8] sm:$0xff]  ;;  %v229_v22 = vld [vmem:[#allocation6 + $0x5c0] sm:$0xff]  ;;  %v1241_v24 = vpack.c.bf16 %v180_v15, %v179_v14  ;;  %v308_v14 = vrot.slane %v1490_v46, %v275_v45  ;;  %v1402_v15 = vmov 0.0|0.0  }
  0x5f   :  { %1184 = vmatprep.subr.bf16.mxu0 %v1183_v55  ;;  %v208_v55 = vld [vmem:[#allocation6 + $0x518] sm:$0xff]  ;;  %v1243_v26 = vpack.c.bf16 %v198_v21, %v197_v20  ;;  %v181_v28 = vld [vmem:[#allocation6 + $0x440] sm:$0xff]  ;;  %v182_v29 = vld [vmem:[#allocation6 + $0x448] sm:$0xff] }
  0x60   :  { %1214 = vmatpush3.bf16.msra.mxu1 %v1213_v54  ;;  %v1263_v54 = vpack.c.bf16 %v224_v44, %v223_v43  ;;  %v1265_v0 = vpack.c.bf16 %v208_v55, %v207_v53  ;;  %v200_v34 = vld [vmem:[#allocation6 + $0x4d8] sm:$0xff]  ;;  %v231_v35 = vld [vmem:[#allocation6 + $0x5d0] sm:$0xff]  ;;  %v234_v51 = vld [vmem:[#allocation6 + $0x5e8] sm:$0xff] }
  0x61   :  { %1216 = vmatprep.subr.bf16.mxu1 %v1215_v60  ;;  %v225_v60 = vld [vmem:[#allocation6 + $0x5a0] sm:$0xff]  ;;  %v232_v36 = vld [vmem:[#allocation6 + $0x5d8] sm:$0xff]  ;;  %v183_v40 = vld [vmem:[#allocation6 + $0x450] sm:$0xff] }
  0x62   :  { %1186 = vmatpush3.bf16.msra.mxu0 %v1185_v2  ;;  %v177_v2 = vld [vmem:[#allocation6 + $0x420] sm:$0xff]  ;;  %v1267_v8 = vpack.c.bf16 %v226_v61, %v225_v60  ;;  %v215_v43 = vld [vmem:[#allocation6 + $0x550] sm:$0xff]  ;;  %v1279_v44 = vpack.c.bf16 %v232_v36, %v231_v35  ;;  %v186_v56 = vld [vmem:[#allocation6 + $0x468] sm:$0xff] }
  0x63   :  { %1188 = vmatprep.subr.bf16.mxu0 %v1187_v4  ;;  %v209_v4 = vld [vmem:[#allocation6 + $0x520] sm:$0xff]  ;;  %v218_v60 = vld [vmem:[#allocation6 + $0x568] sm:$0xff]  ;;  %v203_v61 = vld [vmem:[#allocation6 + $0x4f0] sm:$0xff] }
  0x64   :  { %1218 = vmatpush3.bf16.msra.mxu1 %v1217_v3  ;;  %v178_v3 = vld [vmem:[#allocation6 + $0x428] sm:$0xff]  ;;  %v1269_v11 = vpack.c.bf16 %v210_v5, %v209_v4  ;;  %v185_v55 = vld [vmem:[#allocation6 + $0x460] sm:$0xff]  ;;  %v236_v63 = vld [vmem:[#allocation6 + $0x5f8] sm:$0xff] }
  0x65   :  { %1220 = vmatprep.subr.bf16.mxu1 %v1219_v9  ;;  %v227_v9 = vld [vmem:[#allocation6 + $0x5b0] sm:$0xff]  ;;  %v1237_v13 = vpack.c.bf16 %v178_v3, %v177_v2  ;;  %v217_v57 = vld [vmem:[#allocation6 + $0x560] sm:$0xff]  ;;  %v188_v4 = vld [vmem:[#allocation6 + $0x478] sm:$0xff] }
  0x66   :  { %1190 = vmatpush3.bf16.msra.mxu0 %v1189_v16  ;;  %v211_v16 = vld [vmem:[#allocation6 + $0x530] sm:$0xff]  ;;  %v220_v6 = vld [vmem:[#allocation6 + $0x578] sm:$0xff]  ;;  %v241_v20 = vld [vmem:[#allocation6 + $0x620] sm:$0xff] }
  0x67   :  { %1192 = vmatprep.subr.bf16.mxu0 %v1191_v19  ;;  %v212_v19 = vld [vmem:[#allocation6 + $0x538] sm:$0xff]  ;;  %v187_v3 = vld [vmem:[#allocation6 + $0x470] sm:$0xff]  ;;  %v242_v21 = vld [vmem:[#allocation6 + $0x628] sm:$0xff] }
  0x68   :  { %1222 = vmatpush3.bf16.msra.mxu1 %v1221_v18  ;;  %v1271_v18 = vpack.c.bf16 %v228_v10, %v227_v9  ;;  %v1273_v25 = vpack.c.bf16 %v212_v19, %v211_v16  ;;  %v219_v5 = vld [vmem:[#allocation6 + $0x570] sm:$0xff]  ;;  %v1257_v7 = vpack.c.bf16 %v188_v4, %v187_v3  ;;  %v237_v10 = vld [vmem:[#allocation6 + $0x600] sm:$0xff]  ;;  %v244_v45 = vld [vmem:[#allocation6 + $0x638] sm:$0xff] }
  0x69   :  { %1224 = vmatprep.subr.bf16.mxu1 %v1223_v23  ;;  %v230_v23 = vld [vmem:[#allocation6 + $0x5c8] sm:$0xff]  ;;  %v1289_v9 = vpack.c.bf16 %v220_v6, %v219_v5  ;;  %v239_v16 = vld [vmem:[#allocation6 + $0x610] sm:$0xff] }
  0x6a   :  { %1194 = vmatpush3.bf16.msra.mxu0 %v1193_v30  ;;  %v213_v30 = vld [vmem:[#allocation6 + $0x540] sm:$0xff]  ;;  %v1275_v31 = vpack.c.bf16 %v230_v23, %v229_v22  ;;  %v1404_v22 = vmov 0.0   ;;  %v1298_v23 = vpack.c.bf16 %v242_v21, %v241_v20  ;;  %v251_v36 = vld [vmem:[#allocation6 + $0x670] sm:$0xff] }
  0x6b   :  { %1228 = vmatprep.subr.bf16.mxu0 %v1227_v33  ;;  %v199_v33 = vld [vmem:[#allocation6 + $0x4d0] sm:$0xff] }
  0x6c   :  { %1226 = vmatpush3.bf16.msra.mxu1 %v1225_v32  ;;  %v214_v32 = vld [vmem:[#allocation6 + $0x548] sm:$0xff]  ;;  %v1247_v39 = vpack.c.bf16 %v200_v34, %v199_v33  ;;  %v249_v33 = vld [vmem:[#allocation6 + $0x660] sm:$0xff] }
  0x6d   :  { %1260 = vmatprep.subr.bf16.mxu1 %v1259_v37  ;;  %535 = vmatmul.mubr.f32.vlgmr.msra.gmra.mrb[2].mxu0 %v284_v42  ;;  %v1245_v37 = vpack.c.bf16 %v182_v29, %v181_v28  ;;  %v1277_v38 = vpack.c.bf16 %v214_v32, %v213_v30  ;;  %v184_v42 = vld [vmem:[#allocation6 + $0x458] sm:$0xff]  ;;  %v246_v28 = vld [vmem:[#allocation6 + $0x648] sm:$0xff]  ;;  %v247_v30 = vld [vmem:[#allocation6 + $0x650] sm:$0xff] }
  0x6e   :  { %1230 = vmatpush3.bf16.msra.mxu0 %v1229_v47  ;;  %674 = vmatprep.mubr.f32.mxu0 %v304_v58  ;;  %v216_v47 = vld [vmem:[#allocation6 + $0x558] sm:$0xff]  ;;  %v1249_v52 = vpack.c.bf16 %v184_v42, %v183_v40  ;;  %v250_v34 = vld [vmem:[#allocation6 + $0x668] sm:$0xff] }
  0x6f   :  { %605 = vmatmul.mubr.f32.vlgmr.msra.gmra.mrb[2].mxu1 %v292_v48  ;;  %1232 = vmatprep.subr.bf16.mxu0 %v1231_v50  ;;  %v201_v48 = vld [vmem:[#allocation6 + $0x4e0] sm:$0xff]  ;;  %v1281_v53 = vpack.c.bf16 %v216_v47, %v215_v43  ;;  %v1310_v35 = vpack.c.bf16 %v250_v34, %v249_v33 }
  0x70   :  { %1262 = vmatpush3.bf16.msra.mxu1 %v1261_v49  ;;  %744 = vmatprep.mubr.f32.mxu1 %v312_v17  ;;  %v202_v49 = vld [vmem:[#allocation6 + $0x4e8] sm:$0xff]  ;;  %v233_v50 = vld [vmem:[#allocation6 + $0x5e0] sm:$0xff]  ;;  %v204_v17 = vld [vmem:[#allocation6 + $0x4f8] sm:$0xff] }
  0x71   :  { %1264 = vmatprep.subr.bf16.mxu1 %v1263_v54  ;;  %v1251_v54 = vpack.c.bf16 %v202_v49, %v201_v48  ;;  %v1283_v58 = vpack.c.bf16 %v234_v51, %v233_v50  ;;  %v1255_v2 = vpack.c.bf16 %v204_v17, %v203_v61 }
  0x72   :  { %1234 = vmatpush3.bf16.msra.mxu0 %v1233_v62  ;;  %v235_v62 = vld [vmem:[#allocation6 + $0x5f0] sm:$0xff] }
  0x73   :  { %1236 = vmatprep.subr.bf16.mxu0 %v1235_v1  ;;  %v1285_v1 = vpack.c.bf16 %v218_v60, %v217_v57 }
  0x74   :  { %1266 = vmatpush3.bf16.msra.mxu1 %v1265_v0  ;;  %v1253_v0 = vpack.c.bf16 %v186_v56, %v185_v55 }
  0x75   :  { %1268 = vmatprep.subr.bf16.mxu1 %v1267_v8  ;;  %v1287_v8 = vpack.c.bf16 %v236_v63, %v235_v62 }
  0x76   :  { %1238 = vmatpush3.bf16.msra.mxu0 %v1237_v13  ;;  %v238_v13 = vld [vmem:[#allocation6 + $0x608] sm:$0xff] }
  0x77   :  { %1240 = vmatprep.subr.bf16.mxu0 %v1239_v12  ;;  %v1292_v12 = vpack.c.bf16 %v238_v13, %v237_v10 }
  0x78   :  { %1270 = vmatpush3.bf16.msra.mxu1 %v1269_v11  ;;  %v300_v11 = vrot.slane %v1490_v46, %v1473_v41 }
  0x79   :  { %1272 = vmatprep.subr.bf16.mxu1 %v1271_v18  ;;  %v240_v18 = vld [vmem:[#allocation6 + $0x618] sm:$0xff] }
  0x7a   :  { %1242 = vmatpush3.bf16.msra.mxu0 %v1241_v24  ;;  %v1295_v19 = vpack.c.bf16 %v240_v18, %v239_v16  ;;  %v243_v24 = vld [vmem:[#allocation6 + $0x630] sm:$0xff] }
  0x7b   :  { %1244 = vmatprep.subr.bf16.mxu0 %v1243_v26  ;;  %v245_v26 = vld [vmem:[#allocation6 + $0x640] sm:$0xff] }
  0x7c   :  { %1274 = vmatpush3.bf16.msra.mxu1 %v1273_v25  ;;  %v1301_v25 = vpack.c.bf16 %v244_v45, %v243_v24  ;;  %v1304_v29 = vpack.c.bf16 %v246_v28, %v245_v26 }
  0x7d   :  { %1276 = vmatprep.subr.bf16.mxu1 %v1275_v31  ;;  %v248_v31 = vld [vmem:[#allocation6 + $0x658] sm:$0xff] }
  0x7e   :  { %1246 = vmatpush3.bf16.msra.mxu0 %v1245_v37  ;;  %v1307_v32 = vpack.c.bf16 %v248_v31, %v247_v30  ;;  %v252_v37 = vld [vmem:[#allocation6 + $0x678] sm:$0xff] }
  0x7f   :  { %1248 = vmatprep.subr.bf16.mxu0 %v1247_v39  ;;  %v316_v39 = vrot.slane %v1490_v46, %v283_v27 }
  0x80   :  { %1278 = vmatpush3.bf16.msra.mxu1 %v1277_v38  ;;  %v1313_v38 = vpack.c.bf16 %v252_v37, %v251_v36 }
  0x81   :  { %1280 = vmatprep.subr.bf16.mxu1 %v1279_v44 }
  0x82   :  { %1250 = vmatpush3.bf16.msra.mxu0 %v1249_v52 }
  0x83   :  { %1252 = vmatprep.subr.bf16.mxu0 %v1251_v54 }
  0x84   :  { %1282 = vmatpush3.bf16.msra.mxu1 %v1281_v53 }
  0x85   :  { %1284 = vmatprep.subr.bf16.mxu1 %v1283_v58 }
  0x86   :  { %1254 = vmatpush3.bf16.msra.mxu0 %v1253_v0 }
  0x87   :  { %1256 = vmatprep.subr.bf16.mxu0 %v1255_v2 }
  0x88   :  { %1286 = vmatpush3.bf16.msra.mxu1 %v1285_v1 }
  0x89   :  { %1288 = vmatprep.subr.bf16.mxu1 %v1287_v8 }
  0x8a   :  { %1258 = vmatpush3.bf16.msra.mxu0 %v1257_v7 }
  0x8b   :  { %1291 = vmatprep.subr.bf16.mxu0 %v1402_v15 }
  0x8c   :  { %1290 = vmatpush3.bf16.msra.mxu1 %v1289_v9 }
  0x8d   :  { %675 = vmatmul.mubr.f32.vlgmr.msra.gmra.mrb[4].mxu0 %v300_v11 }
  0x8e   :  { %1293 = vmatpush3.bf16.msra.mxu0 %v1292_v12  ;;  %1096 = vmatprep.mubr.msk.f32.mxu0 %vm1403_vm0, %v1404_v22 }
  0x8f   :  { %745 = vmatmul.mubr.f32.vlgmr.msra.gmra.mrb[4].mxu1 %v308_v14  ;;  %1294 = vmatprep.subr.bf16.mxu0 %v1402_v15 }
  0x92   :  { %1296 = vmatpush3.bf16.msra.mxu0 %v1295_v19 }
  0x93   :  { %1297 = vmatprep.subr.bf16.mxu0 %v1402_v15 }
  0x96   :  { %1299 = vmatpush3.bf16.msra.mxu0 %v1298_v23 }
  0x97   :  { %1300 = vmatprep.subr.bf16.mxu0 %v1402_v15 }
  0x9a   :  { %1302 = vmatpush3.bf16.msra.mxu0 %v1301_v25 }
  0x9b   :  { %1303 = vmatprep.subr.bf16.mxu0 %v1402_v15 }
  0x9e   :  { %1305 = vmatpush3.bf16.msra.mxu0 %v1304_v29 }
  0x9f   :  { %1306 = vmatprep.subr.bf16.mxu0 %v1402_v15 }
  0xa2   :  { %1308 = vmatpush3.bf16.msra.mxu0 %v1307_v32 }
  0xa3   :  { %1309 = vmatprep.subr.bf16.mxu0 %v1402_v15 }
  0xa6   :  { %1311 = vmatpush3.bf16.msra.mxu0 %v1310_v35 }
  0xa7   :  { %1312 = vmatprep.subr.bf16.mxu0 %v1402_v15 }
  0xaa   :  { %1314 = vmatpush3.bf16.msra.mxu0 %v1313_v38 }
  0xad   :  { %1097 = vmatmul.mubr.f32.vlgmr.msra.gmra.mrb[6].mxu0 %v316_v39 }
  0xdb   :  { %v257_v40 = vpop.permute.xlu0 %256 }
  0xdc   :  { %v262_v43 = vrot.slane %v257_v40, %v1473_v41 }
 0x120   :  { %v869_v42 = vpop.f32.mrb[0].mxu0 }
 0x121   :  { %v870_v44 = vpop.f32.mrb[1].mxu0 }
 0x122   :  { %v904_v47 = vpop.f32.mrb[0].mxu1  ;;  %v871_v48 = vadd.f32 %v870_v44, %v869_v42 }
 0x123   :  { %v905_v49 = vpop.f32.mrb[1].mxu1 }
 0x124   :  { %v906_v50 = vadd.f32 %v905_v49, %v904_v47  ;;  %v397_v51 = vadd.f32 %v871_v48, %v262_v43 }
 0x126   :  { %v467_v52 = vadd.f32 %v906_v50, %v397_v51 }
 0x140   :  { %v939_v53 = vpop.f32.mrb[2].mxu0 }
 0x141   :  { %v940_v54 = vpop.f32.mrb[3].mxu0 }
 0x142   :  { %v974_v55 = vpop.f32.mrb[2].mxu1  ;;  %v941_v56 = vadd.f32 %v940_v54, %v939_v53 }
 0x143   :  { %v975_v59 = vpop.f32.mrb[3].mxu1 }
 0x144   :  { %v976_v57 = vadd.f32 %v975_v59, %v974_v55  ;;  %v537_v27 = vadd.f32 %v941_v56, %v467_v52 }
 0x146   :  { %v607_v46 = vadd.f32 %v976_v57, %v537_v27 }
 0x160   :  { %v1009_v58 = vpop.f32.mrb[4].mxu0 }
 0x161   :  { %v1010_v60 = vpop.f32.mrb[5].mxu0 }
 0x162   :  { %v1044_v61 = vpop.f32.mrb[4].mxu1  ;;  %v1011_v17 = vadd.f32 %v1010_v60, %v1009_v58 }
 0x163   :  { %v1045_v41 = vpop.f32.mrb[5].mxu1 }
 0x164   :  { %v1046_v62 = vadd.f32 %v1045_v41, %v1044_v61  ;;  %v677_v63 = vadd.f32 %v1011_v17, %v607_v46 }
 0x166   :  { %v747_v0 = vadd.f32 %v1046_v62, %v677_v63 }
 0x180   :  { %v816_v1 = vpop.f32.mrb[6].mxu0 }
 0x181   :  { %v817_v2 = vadd.f32 %v816_v1, %v747_v0  ;;  %v1098_v3 = vpop.f32.mrb[7].mxu0 }
 0x183   :  { %820 = vst [vmem:[#allocation8] sm:$0x1] %v817_v2 }
 0x184   :  { %1380 = shalt.err (!%p1377_p6)
}
 0x185   :  { %s1381_s17 = scalar_lea.hbm %s1523_s3, 16 }
 0x186   :  { %p1382_p7 = scmp.ne.s32.totalorder %s1523_s3, %s1381_s17  ;;  %p1385_p8 = scmp.lt.u32.totalorder %s1381_s17, %s1523_s3 }
 0x188   :  { %p1387_p9 = pnand %p1385_p8, %p1382_p7 }
 0x18a   :  { %1390 = shalt.err (!%p1387_p9)
}
 0x18b   :  { %830 = dma.vmem_to_hbm [thread:$0]  %s828_s12, 16, %s1523_s3, [#allocation5]  }
 0x18c   :  { %1395 = dma.done.wait [#allocation5], 16  }
 0x18d   :  { %1396 = vsyncadd [#allocation5], 4294967280 }
 0x18e   :  { %834 = vsyncpa [#allocation4], 1 }
 0x18f   :  { %835 = vsyncpa [#allocation7], 1 }
 0x190   :  { %836 = vsyncpa [#allocation5], 1 }

</bundles_post_ra>
